<compile_context>
chip_gen: v7x
topology: tpu7x:2x2x1
jax: 0.10.0
libtpu: 0.0.40
codegen_flags: <defaults>
</compile_context>

<pallas_src>
import jax
import jax.numpy as jnp
from jax.experimental import pallas as pl
from jax.experimental.pallas import tpu as pltpu


def make_rnn_kernel(n_layers: int, seq_len: int, batch: int, d_hid: int,
                    vocab: int, n_out_pad: int):
    """Fused embedding + n-layer tanh RNN + linear head, one batch tile."""

    def kernel(idx_ref, feat_ref, w_ih0_ref, w_hh0_ref, b0_ref, *args):
        # args = [W_ih_1, W_hh_1, b_1, ..., W_ih_{L-1}, W_hh_{L-1}, b_{L-1},
        #         W_out, b_out, out_ref]
        n_rest = 3 * (n_layers - 1)
        rest = args[:n_rest]
        w_out_ref = args[n_rest]
        b_out_ref = args[n_rest + 1]
        out_ref = args[n_rest + 2]

        # ---- hoisted: embedding (one-hot matmul) fused with layer-0 input
        # projection, with the layer-0 bias folded in once:
        #   E      = features @ W_ih_0                 (V, d_hid)
        #   x0_all = onehot(idx) @ E + b0              (S*B, d_hid)
        # TODO(synk): if vocab grows beyond a few hundred, replace the
        # one-hot path / full-table VMEM residency with a scalar-prefetch or
        # DMA row-gather of `features` (v7x has only 64 MiB VMEM).
        e_proj = jnp.dot(feat_ref[...], w_ih0_ref[...],
                         preferred_element_type=jnp.float32)
        ids = idx_ref[...]                                    # (S*B, 1) int32
        iota = jax.lax.broadcasted_iota(jnp.int32,
                                        (seq_len * batch, vocab), 1)
        onehot = (iota == ids).astype(jnp.float32)            # (S*B, V)
        x0_all = jnp.dot(onehot, e_proj,
                         preferred_element_type=jnp.float32)  # (S*B, d_hid)
        x0_all = x0_all + jnp.broadcast_to(b0_ref[...],
                                           (seq_len * batch, d_hid))

        # ---- hoisted weight / bias loads (resident in vregs)
        w_hh0 = w_hh0_ref[...]
        layers = []
        for l in range(n_layers - 1):
            w_ih = rest[3 * l][...]
            w_hh = rest[3 * l + 1][...]
            b = jnp.broadcast_to(rest[3 * l + 2][...], (batch, d_hid))
            layers.append((w_ih, w_hh, b))
        w_out = w_out_ref[...]
        b_out = jnp.broadcast_to(b_out_ref[...], (batch, n_out_pad))

        # ---- peeled t = 0: initial hidden state is zero, so every h @ W_hh
        # matmul is skipped; biases already folded in.
        h = [None] * n_layers
        r = [None] * n_layers          # precomputed recurrent term h@W_hh + b
        h[0] = jnp.tanh(x0_all[0:batch, :])
        if seq_len > 1:
            r[0] = jnp.dot(h[0], w_hh0, preferred_element_type=jnp.float32)
        inp = h[0]
        for l in range(1, n_layers):
            w_ih, w_hh, b = layers[l - 1]
            h[l] = jnp.tanh(
                jnp.dot(inp, w_ih, preferred_element_type=jnp.float32) + b)
            if seq_len > 1:
                r[l] = jnp.dot(h[l], w_hh,
                               preferred_element_type=jnp.float32) + b
            inp = h[l]

        # ---- fully unrolled tanh recurrence; hidden states are values.
        # The recurrent term r[l] for step t+1 is produced right after h[l]_t,
        # off the input-path serial chain (no concatenate, no per-step bias).
        # TODO(synk): if seq_len / n_layers grow beyond toy sizes, switch to
        # lax.fori_loop(..., unroll=True) with x0_all in a VMEM scratch to
        # bound vreg pressure.
        for t in range(1, seq_len):
            last = (t == seq_len - 1)
            x0 = x0_all[t * batch:(t + 1) * batch, :]          # static slice
            h[0] = jnp.tanh(x0 + r[0])
            if not last:
                r[0] = jnp.dot(h[0], w_hh0,
                               preferred_element_type=jnp.float32)
            inp = h[0]
            for l in range(1, n_layers):
                w_ih, w_hh, b = layers[l - 1]
                h[l] = jnp.tanh(
                    jnp.dot(inp, w_ih, preferred_element_type=jnp.float32)
                    + r[l])
                if not last:
                    r[l] = jnp.dot(h[l], w_hh,
                                   preferred_element_type=jnp.float32) + b
                inp = h[l]

        # ---- linear head on last timestep of top layer (lane-dense output)
        out_ref[...] = (
            jnp.dot(h[-1], w_out, preferred_element_type=jnp.float32)
            + b_out)

    return kernel


def feature_rnn_forward(batch_idx, features, rnn_params, out_w, out_b,
                        *, batch_tile=8):
    """batch_idx: (B, S) int32 symbol ids; features: (V, d_feats) table.

    rnn_params: list of (W_ih (in,d_hid), W_hh (d_hid,d_hid), b (1,d_hid)).
    Batch rows are tiled on a parallel grid axis (batch_tile rows / step).
    """
    B, S = batch_idx.shape
    V, _ = features.shape
    n_layers = len(rnn_params)
    d_hid = rnn_params[0][1].shape[0]
    n_out = out_w.shape[1]

    BT = batch_tile
    B_pad = ((B + BT - 1) // BT) * BT
    n_tiles = B_pad // BT

    # lane-dense output: pad head columns to a multiple of 128
    n_out_pad = ((n_out + 127) // 128) * 128
    out_w_p = jnp.pad(out_w, ((0, 0), (0, n_out_pad - n_out)))
    out_b_p = jnp.pad(out_b, ((0, 0), (0, n_out_pad - n_out)))

    # indices: per-tile, time-major layout, shape (n_tiles * S * BT, 1)
    idx = jnp.pad(batch_idx.astype(jnp.int32), ((0, B_pad - B), (0, 0)))
    idx = idx.reshape(n_tiles, BT, S)
    idx = jnp.transpose(idx, (0, 2, 1))                   # (n_tiles, S, BT)
    idx_col = idx.reshape(n_tiles * S * BT, 1)

    # pack inputs: layer-0 split (input proj hoisted), layers>=1 kept split
    # so the recurrent matmul can be precomputed off the critical path.
    w_ih0, w_hh0, b0 = rnn_params[0]
    inputs = [idx_col, features.astype(jnp.float32), w_ih0, w_hh0, b0]
    for (w_ih, w_hh, b) in rnn_params[1:]:
        inputs += [w_ih, w_hh, b]
    inputs += [out_w_p, out_b_p]

    kernel = make_rnn_kernel(n_layers, S, BT, d_hid, V, n_out_pad)

    def full_spec(arr):
        return pl.BlockSpec(arr.shape, lambda i: (0, 0))

    in_specs = [pl.BlockSpec((S * BT, 1), lambda i: (i, 0))]
    in_specs += [full_spec(a) for a in inputs[1:]]

    out_full = pl.pallas_call(
        kernel,
        out_shape=jax.ShapeDtypeStruct((B_pad, n_out_pad), jnp.float32),
        grid=(n_tiles,),
        in_specs=in_specs,
        out_specs=pl.BlockSpec((BT, n_out_pad), lambda i: (i, 0)),
        compiler_params=pltpu.CompilerParams(
            dimension_semantics=("parallel",)),
    )(*inputs)

    return out_full[:B, :n_out]


def reference_forward(batch_idx, features, rnn_params, out_w, out_b):
    """Pure-JAX reference matching torch nn.RNN(tanh) + nn.Linear."""
    x = features[batch_idx].astype(jnp.float32)  # (B, S, F)
    B, S, _ = x.shape
    n_layers = len(rnn_params)
    d_hid = rnn_params[0][1].shape[0]
    h = [jnp.zeros((B, d_hid), jnp.float32) for _ in range(n_layers)]
    for t in range(S):
        inp = x[:, t, :]
        for l, (w_ih, w_hh, b) in enumerate(rnn_params):
            h[l] = jnp.tanh(inp @ w_ih + h[l] @ w_hh + b)
            inp = h[l]
    return h[-1] @ out_w + out_b


if __name__ == "__main__":
    # params implied by the module: inv_size (vocab), d_feats, num_layers, d_hid
    INV_SIZE = 16       # vocabulary / inventory size
    D_FEATS = 16        # feature dimension (RNN input size)
    NUM_LAYERS = 2
    D_HID = 32
    BATCH = 12          # > batch_tile so the parallel grid has 2 tiles
    SEQ_LEN = 8

    key = jax.random.PRNGKey(0)
    keys = jax.random.split(key, 4 + 3 * NUM_LAYERS)

    # feature table: (inventory_size, num_feats)
    features = jax.random.normal(keys[0], (INV_SIZE, D_FEATS), jnp.float32)

    # deterministic RNN parameters; weights stored pre-transposed as (in, out)
    scale = 1.0 / jnp.sqrt(jnp.float32(D_HID))
    rnn_params = []
    for l in range(NUM_LAYERS):
        d_in = D_FEATS if l == 0 else D_HID
        kw = keys[1 + 3 * l: 4 + 3 * l]
        w_ih = jax.random.uniform(kw[0], (d_in, D_HID), jnp.float32,
                                  -scale, scale)
        w_hh = jax.random.uniform(kw[1], (D_HID, D_HID), jnp.float32,
                                  -scale, scale)
        # combined bias b_ih + b_hh, kept 2-D for clean VMEM broadcast
        b = jax.random.uniform(kw[2], (1, D_HID), jnp.float32, -scale, scale)
        rnn_params.append((w_ih, w_hh, b))

    out_w = jax.random.uniform(keys[-3], (D_HID, INV_SIZE), jnp.float32,
                               -scale, scale)
    out_b = jax.random.uniform(keys[-2], (1, INV_SIZE), jnp.float32,
                               -scale, scale)

    # integer symbol batch: (batches, seq_len)
    batch_idx = jax.random.randint(keys[-1], (BATCH, SEQ_LEN), 0, INV_SIZE,
                                   dtype=jnp.int32)

    out = feature_rnn_forward(batch_idx, features, rnn_params, out_w, out_b)
    out = jax.block_until_ready(out)

    ref = reference_forward(batch_idx, features, rnn_params, out_w, out_b)
    assert out.shape == (BATCH, INV_SIZE)
    assert jnp.allclose(out, ref, atol=1e-5, rtol=1e-5), "mismatch vs reference"

    print("KERNEL_OK")
</pallas_src>

<mosaic_0001>
module attributes {stable_mosaic.version = 11 : i64} {
  func.func @kernel(%arg0: i32, %arg1: memref<64x1xi32, #tpu.memory_space<vmem>>, %arg2: memref<16x16xf32, #tpu.memory_space<vmem>>, %arg3: memref<16x32xf32, #tpu.memory_space<vmem>>, %arg4: memref<32x32xf32, #tpu.memory_space<vmem>>, %arg5: memref<1x32xf32, #tpu.memory_space<vmem>>, %arg6: memref<32x32xf32, #tpu.memory_space<vmem>>, %arg7: memref<32x32xf32, #tpu.memory_space<vmem>>, %arg8: memref<1x32xf32, #tpu.memory_space<vmem>>, %arg9: memref<32x128xf32, #tpu.memory_space<vmem>>, %arg10: memref<1x128xf32, #tpu.memory_space<vmem>>, %arg11: memref<8x128xf32, #tpu.memory_space<vmem>>) attributes {dimension_semantics = [#tpu.dimension_semantics<parallel>], iteration_bounds = array<i64: 2>, scalar_prefetch = 0 : i64, scratch_operands = 0 : i64, tpu.core_type = #tpu.core_type<tc>, window_params = [{transform_indices = @transform_0, window_bounds = array<i64: 64, 1>}, {pipeline_mode = #tpu.pipeline_mode<synchronous>, transform_indices = @transform_1, window_bounds = array<i64: 16, 16>}, {pipeline_mode = #tpu.pipeline_mode<synchronous>, transform_indices = @transform_2, window_bounds = array<i64: 16, 32>}, {pipeline_mode = #tpu.pipeline_mode<synchronous>, transform_indices = @transform_3, window_bounds = array<i64: 32, 32>}, {pipeline_mode = #tpu.pipeline_mode<synchronous>, transform_indices = @transform_4, window_bounds = array<i64: 1, 32>}, {pipeline_mode = #tpu.pipeline_mode<synchronous>, transform_indices = @transform_5, window_bounds = array<i64: 32, 32>}, {pipeline_mode = #tpu.pipeline_mode<synchronous>, transform_indices = @transform_6, window_bounds = array<i64: 32, 32>}, {pipeline_mode = #tpu.pipeline_mode<synchronous>, transform_indices = @transform_7, window_bounds = array<i64: 1, 32>}, {pipeline_mode = #tpu.pipeline_mode<synchronous>, transform_indices = @transform_8, window_bounds = array<i64: 32, 128>}, {pipeline_mode = #tpu.pipeline_mode<synchronous>, transform_indices = @transform_9, window_bounds = array<i64: 1, 128>}, {transform_indices = @transform_10, window_bounds = array<i64: 8, 128>}]} {
    %c0 = arith.constant 0 : index
    %c0_0 = arith.constant 0 : index
    %0 = vector.load %arg2[%c0, %c0_0] : memref<16x16xf32, #tpu.memory_space<vmem>>, vector<16x16xf32>
    %c0_1 = arith.constant 0 : index
    %c0_2 = arith.constant 0 : index
    %1 = vector.load %arg3[%c0_1, %c0_2] : memref<16x32xf32, #tpu.memory_space<vmem>>, vector<16x32xf32>
    %cst = arith.constant dense<0.000000e+00> : vector<16x32xf32>
    %2 = tpu.matmul %0, %1, %cst {dimension_numbers = #tpu.dot_dimension_numbers<[1], [0], [0], [1], [0, 0, 1, 1], [], []>} : vector<16x16xf32>, vector<16x32xf32>, vector<16x32xf32> -> vector<16x32xf32>
    %c0_3 = arith.constant 0 : index
    %c0_4 = arith.constant 0 : index
    %3 = vector.load %arg1[%c0_3, %c0_4] : memref<64x1xi32, #tpu.memory_space<vmem>>, vector<64x1xi32>
    %4 = tpu.iota {dimensions = array<i32: 1>} : vector<64x16xi32>
    %5 = vector.broadcast %3 : vector<64x1xi32> to vector<64x16xi32>
    %6 = arith.cmpi eq, %4, %5 : vector<64x16xi32>
    %7 = arith.extui %6 : vector<64x16xi1> to vector<64x16xi32>
    %8 = arith.sitofp %7 : vector<64x16xi32> to vector<64x16xf32>
    %cst_5 = arith.constant dense<0.000000e+00> : vector<64x32xf32>
    %9 = tpu.matmul %8, %2, %cst_5 {dimension_numbers = #tpu.dot_dimension_numbers<[1], [0], [0], [1], [0, 0, 1, 1], [], []>} : vector<64x16xf32>, vector<16x32xf32>, vector<64x32xf32> -> vector<64x32xf32>
    %c0_6 = arith.constant 0 : index
    %c0_7 = arith.constant 0 : index
    %10 = vector.load %arg5[%c0_6, %c0_7] : memref<1x32xf32, #tpu.memory_space<vmem>>, vector<1x32xf32>
    %11 = vector.shape_cast %10 : vector<1x32xf32> to vector<1x32xf32>
    %12 = vector.broadcast %11 : vector<1x32xf32> to vector<64x32xf32>
    %13 = arith.addf %9, %12 : vector<64x32xf32>
    %c0_8 = arith.constant 0 : index
    %c0_9 = arith.constant 0 : index
    %14 = vector.load %arg4[%c0_8, %c0_9] : memref<32x32xf32, #tpu.memory_space<vmem>>, vector<32x32xf32>
    %c0_10 = arith.constant 0 : index
    %c0_11 = arith.constant 0 : index
    %15 = vector.load %arg6[%c0_10, %c0_11] : memref<32x32xf32, #tpu.memory_space<vmem>>, vector<32x32xf32>
    %c0_12 = arith.constant 0 : index
    %c0_13 = arith.constant 0 : index
    %16 = vector.load %arg7[%c0_12, %c0_13] : memref<32x32xf32, #tpu.memory_space<vmem>>, vector<32x32xf32>
    %c0_14 = arith.constant 0 : index
    %c0_15 = arith.constant 0 : index
    %17 = vector.load %arg8[%c0_14, %c0_15] : memref<1x32xf32, #tpu.memory_space<vmem>>, vector<1x32xf32>
    %18 = vector.shape_cast %17 : vector<1x32xf32> to vector<1x32xf32>
    %19 = vector.broadcast %18 : vector<1x32xf32> to vector<8x32xf32>
    %c0_16 = arith.constant 0 : index
    %c0_17 = arith.constant 0 : index
    %20 = vector.load %arg9[%c0_16, %c0_17] : memref<32x128xf32, #tpu.memory_space<vmem>>, vector<32x128xf32>
    %c0_18 = arith.constant 0 : index
    %c0_19 = arith.constant 0 : index
    %21 = vector.load %arg10[%c0_18, %c0_19] : memref<1x128xf32, #tpu.memory_space<vmem>>, vector<1x128xf32>
    %22 = vector.shape_cast %21 : vector<1x128xf32> to vector<1x128xf32>
    %23 = vector.broadcast %22 : vector<1x128xf32> to vector<8x128xf32>
    %24 = vector.extract_strided_slice %13 {offsets = [0, 0], sizes = [8, 32], strides = [1, 1]} : vector<64x32xf32> to vector<8x32xf32>
    %25 = math.tanh %24 : vector<8x32xf32>
    %cst_20 = arith.constant dense<0.000000e+00> : vector<8x32xf32>
    %26 = tpu.matmul %25, %14, %cst_20 {dimension_numbers = #tpu.dot_dimension_numbers<[1], [0], [0], [1], [0, 0, 1, 1], [], []>} : vector<8x32xf32>, vector<32x32xf32>, vector<8x32xf32> -> vector<8x32xf32>
    %cst_21 = arith.constant dense<0.000000e+00> : vector<8x32xf32>
    %27 = tpu.matmul %25, %15, %cst_21 {dimension_numbers = #tpu.dot_dimension_numbers<[1], [0], [0], [1], [0, 0, 1, 1], [], []>} : vector<8x32xf32>, vector<32x32xf32>, vector<8x32xf32> -> vector<8x32xf32>
    %28 = arith.addf %27, %19 : vector<8x32xf32>
    %29 = math.tanh %28 : vector<8x32xf32>
    %cst_22 = arith.constant dense<0.000000e+00> : vector<8x32xf32>
    %30 = tpu.matmul %29, %16, %cst_22 {dimension_numbers = #tpu.dot_dimension_numbers<[1], [0], [0], [1], [0, 0, 1, 1], [], []>} : vector<8x32xf32>, vector<32x32xf32>, vector<8x32xf32> -> vector<8x32xf32>
    %31 = arith.addf %30, %19 : vector<8x32xf32>
    %32 = vector.extract_strided_slice %13 {offsets = [8, 0], sizes = [8, 32], strides = [1, 1]} : vector<64x32xf32> to vector<8x32xf32>
    %33 = arith.addf %32, %26 : vector<8x32xf32>
    %34 = math.tanh %33 : vector<8x32xf32>
    %cst_23 = arith.constant dense<0.000000e+00> : vector<8x32xf32>
    %35 = tpu.matmul %34, %14, %cst_23 {dimension_numbers = #tpu.dot_dimension_numbers<[1], [0], [0], [1], [0, 0, 1, 1], [], []>} : vector<8x32xf32>, vector<32x32xf32>, vector<8x32xf32> -> vector<8x32xf32>
    %cst_24 = arith.constant dense<0.000000e+00> : vector<8x32xf32>
    %36 = tpu.matmul %34, %15, %cst_24 {dimension_numbers = #tpu.dot_dimension_numbers<[1], [0], [0], [1], [0, 0, 1, 1], [], []>} : vector<8x32xf32>, vector<32x32xf32>, vector<8x32xf32> -> vector<8x32xf32>
    %37 = arith.addf %36, %31 : vector<8x32xf32>
    %38 = math.tanh %37 : vector<8x32xf32>
    %cst_25 = arith.constant dense<0.000000e+00> : vector<8x32xf32>
    %39 = tpu.matmul %38, %16, %cst_25 {dimension_numbers = #tpu.dot_dimension_numbers<[1], [0], [0], [1], [0, 0, 1, 1], [], []>} : vector<8x32xf32>, vector<32x32xf32>, vector<8x32xf32> -> vector<8x32xf32>
    %40 = arith.addf %39, %19 : vector<8x32xf32>
    %41 = vector.extract_strided_slice %13 {offsets = [16, 0], sizes = [8, 32], strides = [1, 1]} : vector<64x32xf32> to vector<8x32xf32>
    %42 = arith.addf %41, %35 : vector<8x32xf32>
    %43 = math.tanh %42 : vector<8x32xf32>
    %cst_26 = arith.constant dense<0.000000e+00> : vector<8x32xf32>
    %44 = tpu.matmul %43, %14, %cst_26 {dimension_numbers = #tpu.dot_dimension_numbers<[1], [0], [0], [1], [0, 0, 1, 1], [], []>} : vector<8x32xf32>, vector<32x32xf32>, vector<8x32xf32> -> vector<8x32xf32>
    %cst_27 = arith.constant dense<0.000000e+00> : vector<8x32xf32>
    %45 = tpu.matmul %43, %15, %cst_27 {dimension_numbers = #tpu.dot_dimension_numbers<[1], [0], [0], [1], [0, 0, 1, 1], [], []>} : vector<8x32xf32>, vector<32x32xf32>, vector<8x32xf32> -> vector<8x32xf32>
    %46 = arith.addf %45, %40 : vector<8x32xf32>
    %47 = math.tanh %46 : vector<8x32xf32>
    %cst_28 = arith.constant dense<0.000000e+00> : vector<8x32xf32>
    %48 = tpu.matmul %47, %16, %cst_28 {dimension_numbers = #tpu.dot_dimension_numbers<[1], [0], [0], [1], [0, 0, 1, 1], [], []>} : vector<8x32xf32>, vector<32x32xf32>, vector<8x32xf32> -> vector<8x32xf32>
    %49 = arith.addf %48, %19 : vector<8x32xf32>
    %50 = vector.extract_strided_slice %13 {offsets = [24, 0], sizes = [8, 32], strides = [1, 1]} : vector<64x32xf32> to vector<8x32xf32>
    %51 = arith.addf %50, %44 : vector<8x32xf32>
    %52 = math.tanh %51 : vector<8x32xf32>
    %cst_29 = arith.constant dense<0.000000e+00> : vector<8x32xf32>
    %53 = tpu.matmul %52, %14, %cst_29 {dimension_numbers = #tpu.dot_dimension_numbers<[1], [0], [0], [1], [0, 0, 1, 1], [], []>} : vector<8x32xf32>, vector<32x32xf32>, vector<8x32xf32> -> vector<8x32xf32>
    %cst_30 = arith.constant dense<0.000000e+00> : vector<8x32xf32>
    %54 = tpu.matmul %52, %15, %cst_30 {dimension_numbers = #tpu.dot_dimension_numbers<[1], [0], [0], [1], [0, 0, 1, 1], [], []>} : vector<8x32xf32>, vector<32x32xf32>, vector<8x32xf32> -> vector<8x32xf32>
    %55 = arith.addf %54, %49 : vector<8x32xf32>
    %56 = math.tanh %55 : vector<8x32xf32>
    %cst_31 = arith.constant dense<0.000000e+00> : vector<8x32xf32>
    %57 = tpu.matmul %56, %16, %cst_31 {dimension_numbers = #tpu.dot_dimension_numbers<[1], [0], [0], [1], [0, 0, 1, 1], [], []>} : vector<8x32xf32>, vector<32x32xf32>, vector<8x32xf32> -> vector<8x32xf32>
    %58 = arith.addf %57, %19 : vector<8x32xf32>
    %59 = vector.extract_strided_slice %13 {offsets = [32, 0], sizes = [8, 32], strides = [1, 1]} : vector<64x32xf32> to vector<8x32xf32>
    %60 = arith.addf %59, %53 : vector<8x32xf32>
    %61 = math.tanh %60 : vector<8x32xf32>
    %cst_32 = arith.constant dense<0.000000e+00> : vector<8x32xf32>
    %62 = tpu.matmul %61, %14, %cst_32 {dimension_numbers = #tpu.dot_dimension_numbers<[1], [0], [0], [1], [0, 0, 1, 1], [], []>} : vector<8x32xf32>, vector<32x32xf32>, vector<8x32xf32> -> vector<8x32xf32>
    %cst_33 = arith.constant dense<0.000000e+00> : vector<8x32xf32>
    %63 = tpu.matmul %61, %15, %cst_33 {dimension_numbers = #tpu.dot_dimension_numbers<[1], [0], [0], [1], [0, 0, 1, 1], [], []>} : vector<8x32xf32>, vector<32x32xf32>, vector<8x32xf32> -> vector<8x32xf32>
    %64 = arith.addf %63, %58 : vector<8x32xf32>
    %65 = math.tanh %64 : vector<8x32xf32>
    %cst_34 = arith.constant dense<0.000000e+00> : vector<8x32xf32>
    %66 = tpu.matmul %65, %16, %cst_34 {dimension_numbers = #tpu.dot_dimension_numbers<[1], [0], [0], [1], [0, 0, 1, 1], [], []>} : vector<8x32xf32>, vector<32x32xf32>, vector<8x32xf32> -> vector<8x32xf32>
    %67 = arith.addf %66, %19 : vector<8x32xf32>
    %68 = vector.extract_strided_slice %13 {offsets = [40, 0], sizes = [8, 32], strides = [1, 1]} : vector<64x32xf32> to vector<8x32xf32>
    %69 = arith.addf %68, %62 : vector<8x32xf32>
    %70 = math.tanh %69 : vector<8x32xf32>
    %cst_35 = arith.constant dense<0.000000e+00> : vector<8x32xf32>
    %71 = tpu.matmul %70, %14, %cst_35 {dimension_numbers = #tpu.dot_dimension_numbers<[1], [0], [0], [1], [0, 0, 1, 1], [], []>} : vector<8x32xf32>, vector<32x32xf32>, vector<8x32xf32> -> vector<8x32xf32>
    %cst_36 = arith.constant dense<0.000000e+00> : vector<8x32xf32>
    %72 = tpu.matmul %70, %15, %cst_36 {dimension_numbers = #tpu.dot_dimension_numbers<[1], [0], [0], [1], [0, 0, 1, 1], [], []>} : vector<8x32xf32>, vector<32x32xf32>, vector<8x32xf32> -> vector<8x32xf32>
    %73 = arith.addf %72, %67 : vector<8x32xf32>
    %74 = math.tanh %73 : vector<8x32xf32>
    %cst_37 = arith.constant dense<0.000000e+00> : vector<8x32xf32>
    %75 = tpu.matmul %74, %16, %cst_37 {dimension_numbers = #tpu.dot_dimension_numbers<[1], [0], [0], [1], [0, 0, 1, 1], [], []>} : vector<8x32xf32>, vector<32x32xf32>, vector<8x32xf32> -> vector<8x32xf32>
    %76 = arith.addf %75, %19 : vector<8x32xf32>
    %77 = vector.extract_strided_slice %13 {offsets = [48, 0], sizes = [8, 32], strides = [1, 1]} : vector<64x32xf32> to vector<8x32xf32>
    %78 = arith.addf %77, %71 : vector<8x32xf32>
    %79 = math.tanh %78 : vector<8x32xf32>
    %cst_38 = arith.constant dense<0.000000e+00> : vector<8x32xf32>
    %80 = tpu.matmul %79, %14, %cst_38 {dimension_numbers = #tpu.dot_dimension_numbers<[1], [0], [0], [1], [0, 0, 1, 1], [], []>} : vector<8x32xf32>, vector<32x32xf32>, vector<8x32xf32> -> vector<8x32xf32>
    %cst_39 = arith.constant dense<0.000000e+00> : vector<8x32xf32>
    %81 = tpu.matmul %79, %15, %cst_39 {dimension_numbers = #tpu.dot_dimension_numbers<[1], [0], [0], [1], [0, 0, 1, 1], [], []>} : vector<8x32xf32>, vector<32x32xf32>, vector<8x32xf32> -> vector<8x32xf32>
    %82 = arith.addf %81, %76 : vector<8x32xf32>
    %83 = math.tanh %82 : vector<8x32xf32>
    %cst_40 = arith.constant dense<0.000000e+00> : vector<8x32xf32>
    %84 = tpu.matmul %83, %16, %cst_40 {dimension_numbers = #tpu.dot_dimension_numbers<[1], [0], [0], [1], [0, 0, 1, 1], [], []>} : vector<8x32xf32>, vector<32x32xf32>, vector<8x32xf32> -> vector<8x32xf32>
    %85 = arith.addf %84, %19 : vector<8x32xf32>
    %86 = vector.extract_strided_slice %13 {offsets = [56, 0], sizes = [8, 32], strides = [1, 1]} : vector<64x32xf32> to vector<8x32xf32>
    %87 = arith.addf %86, %80 : vector<8x32xf32>
    %88 = math.tanh %87 : vector<8x32xf32>
    %cst_41 = arith.constant dense<0.000000e+00> : vector<8x32xf32>
    %89 = tpu.matmul %88, %15, %cst_41 {dimension_numbers = #tpu.dot_dimension_numbers<[1], [0], [0], [1], [0, 0, 1, 1], [], []>} : vector<8x32xf32>, vector<32x32xf32>, vector<8x32xf32> -> vector<8x32xf32>
    %90 = arith.addf %89, %85 : vector<8x32xf32>
    %91 = math.tanh %90 : vector<8x32xf32>
    %cst_42 = arith.constant dense<0.000000e+00> : vector<8x128xf32>
    %92 = tpu.matmul %91, %20, %cst_42 {dimension_numbers = #tpu.dot_dimension_numbers<[1], [0], [0], [1], [0, 0, 1, 1], [], []>} : vector<8x32xf32>, vector<32x128xf32>, vector<8x128xf32> -> vector<8x128xf32>
    %93 = arith.addf %92, %23 : vector<8x128xf32>
    %c0_43 = arith.constant 0 : index
    %c0_44 = arith.constant 0 : index
    %94 = vector.load %arg11[%c0_43, %c0_44] : memref<8x128xf32, #tpu.memory_space<vmem>>, vector<8x128xf32>
    tpu.vector_store %arg11[%c0_43, %c0_44], %93 {strides = array<i32>} : memref<8x128xf32, #tpu.memory_space<vmem>>, vector<8x128xf32>,
    return
  }
  func.func @transform_0(%arg0: i32) -> (i32, i32) {
    %c0_i32 = arith.constant 0 : i32
    %c0_i32_0 = arith.constant 0 : i32
    return %arg0, %c0_i32 : i32, i32
  }
  func.func @transform_1(%arg0: i32) -> (i32, i32) {
    %c0_i32 = arith.constant 0 : i32
    %c0_i32_0 = arith.constant 0 : i32
    %c0_i32_1 = arith.constant 0 : i32
    return %c0_i32, %c0_i32_0 : i32, i32
  }
  func.func @transform_2(%arg0: i32) -> (i32, i32) {
    %c0_i32 = arith.constant 0 : i32
    %c0_i32_0 = arith.constant 0 : i32
    %c0_i32_1 = arith.constant 0 : i32
    return %c0_i32, %c0_i32_0 : i32, i32
  }
  func.func @transform_3(%arg0: i32) -> (i32, i32) {
    %c0_i32 = arith.constant 0 : i32
    %c0_i32_0 = arith.constant 0 : i32
    %c0_i32_1 = arith.constant 0 : i32
    return %c0_i32, %c0_i32_0 : i32, i32
  }
  func.func @transform_4(%arg0: i32) -> (i32, i32) {
    %c0_i32 = arith.constant 0 : i32
    %c0_i32_0 = arith.constant 0 : i32
    %c0_i32_1 = arith.constant 0 : i32
    return %c0_i32, %c0_i32_0 : i32, i32
  }
  func.func @transform_5(%arg0: i32) -> (i32, i32) {
    %c0_i32 = arith.constant 0 : i32
    %c0_i32_0 = arith.constant 0 : i32
    %c0_i32_1 = arith.constant 0 : i32
    return %c0_i32, %c0_i32_0 : i32, i32
  }
  func.func @transform_6(%arg0: i32) -> (i32, i32) {
    %c0_i32 = arith.constant 0 : i32
    %c0_i32_0 = arith.constant 0 : i32
    %c0_i32_1 = arith.constant 0 : i32
    return %c0_i32, %c0_i32_0 : i32, i32
  }
  func.func @transform_7(%arg0: i32) -> (i32, i32) {
    %c0_i32 = arith.constant 0 : i32
    %c0_i32_0 = arith.constant 0 : i32
    %c0_i32_1 = arith.constant 0 : i32
    return %c0_i32, %c0_i32_0 : i32, i32
  }
  func.func @transform_8(%arg0: i32) -> (i32, i32) {
    %c0_i32 = arith.constant 0 : i32
    %c0_i32_0 = arith.constant 0 : i32
    %c0_i32_1 = arith.constant 0 : i32
    return %c0_i32, %c0_i32_0 : i32, i32
  }
  func.func @transform_9(%arg0: i32) -> (i32, i32) {
    %c0_i32 = arith.constant 0 : i32
    %c0_i32_0 = arith.constant 0 : i32
    %c0_i32_1 = arith.constant 0 : i32
    return %c0_i32, %c0_i32_0 : i32, i32
  }
  func.func @transform_10(%arg0: i32) -> (i32, i32) {
    %c0_i32 = arith.constant 0 : i32
    %c0_i32_0 = arith.constant 0 : i32
    return %arg0, %c0_i32 : i32, i32
  }
}

</mosaic_0001>

<bundles_post_ra>
// kernel: tpu_custom_call.1
= control target key start
LH: loop header
LB: loop body
LE: loop exit
PB: predicated region body
PF: predicated region fallthrough
CT: control target
= control target key end

     0   :  { %15 = vsyncpa [#allocation3], 0  ;;  %s3873_s0 = inlined_call_operand.vmem [shape: s32[128,1], index: 0, kind: input, shape index: {}]   ;;  %s3874_s1 = inlined_call_operand.hbm [shape: f32[16,16], index: 1, kind: input, shape index: {}]   ;;  %s3875_s2 = inlined_call_operand.hbm [shape: f32[16,32], index: 2, kind: input, shape index: {}]   ;;  %s3876_s3 = inlined_call_operand.vmem [shape: f32[32,32], index: 3, kind: input, shape index: {}]   ;;  %s3877_s4 = inlined_call_operand.vmem [shape: f32[1,32], index: 4, kind: input, shape index: {}]   ;;  %s3878_s5 = inlined_call_operand.vmem [shape: f32[32,32], index: 5, kind: input, shape index: {}]   ;;  %s3879_s6 = inlined_call_operand.vmem [shape: f32[32,32], index: 6, kind: input, shape index: {}]   ;;  %s3880_s7 = inlined_call_operand.vmem [shape: f32[1,32], index: 7, kind: input, shape index: {}]   ;;  %s3881_s8 = inlined_call_operand.vmem [shape: f32[32,128], index: 8, kind: input, shape index: {}]   ;;  %s3882_s9 = inlined_call_operand.vmem [shape: f32[1,128], index: 9, kind: input, shape index: {}]   ;;  %s3883_s10 = inlined_call_operand.hbm [shape: f32[16,128], index: 10, kind: output, shape index: {}]  }
   0x1   :  { %16 = vsyncpa [#allocation6], 0 }
   0x2   :  { %17 = vsyncpa [#allocation4], 0 }
   0x3   :  { %19 = vsyncpa [#allocation4 + $0x1], 0  ;;  %s3401_s13 = smov 0   ;;  %s3403_s14 = smov 0  }
   0x4   :  { %s3405_s15 = smov 0   ;;  %s3407_s16 = smov 0  }
   0x5 LB: > { %3891 = sst [smem:[#allocation11_spill]] %s3331_s15  ;;  %s3422_s17 = sadd.s32 4294967295, %s3335_s16   ;;  %s3335_s16 = sphi %s3407_s16, %s3907_s16   ;;  %s3331_s15 = sphi %s3405_s15, %s3909_s15   ;;  %s3327_s14 = sphi %s3403_s14, %s3911_s14   ;;  %s3323_s13 = sphi %s3401_s13, %s3910_s13  }
   0x6   : > { %s2478_s18 = sadd.s32 4294967294, %s3335_s16   ;;  %s3426_s19 = sadd.s32 1, %s3335_s16  }
   0x7   : > { %3892 = sst [smem:[#allocation12_spill]] %s3426_s19  ;;  %s247_s20 = sadd.s32 1, %s3331_s15 }
   0x8   : > { %s244_s21 = ssub.s32 %s3335_s16, %s3426_s19  ;;  %p257_p0 = scmp.ne.s32.totalorder %s3331_s15, %s3327_s14 }
   0x9   : > { %p245_p1 = scmp.eq.s32.totalorder %s244_s21, 0  ;;  %p258_p2 = scmp.eq.s32.totalorder %s3422_s17, 1 }
   0xa   : > { %p263_p3 = scmp.ne.s32.totalorder %s3327_s14, %s3323_s13  ;;  %p264_p4 = scmp.eq.s32.totalorder %s2478_s18, 1 }
   0xb   : > { %s3437_s22 = scalar_select %p245_p1, %s3331_s15, %s247_s20  }
   0xc   : > { %p3439_p5 = por %p258_p2, %p257_p0  ;;  %p3443_p6 = por %p264_p4, %p263_p3 }
   0xd   : > { %3893 = sst [smem:[#allocation13_spill]] %s3437_s22  ;;  %p2479_p7 = scmp.ge.s32.totalorder %s3335_s16, 1 }
   0xe   : > { %s3894_s23 = scalar_select %p3439_p5, 1, 0 }
   0xf   : > { %s3895_s24 = scalar_select %p3443_p6, 1, 0 }
  0x10   : > { %p271_p8 = scmp.lt.s32.totalorder %s3335_s16, 3  ;;  %p3884_p9 = scmp.eq.s32.totalorder %s3422_s17, 0 }
  0x11   : > { %3896 = sst [smem:[#allocation14_spill]] %s3895_s24  ;;  %s3337_s26 = smov [#allocation2]  }
  0x12   : > { %p3450_p10 = pnand %p2479_p7, %p271_p8  ;;  %s283_s27 = sshll.u32 %s3337_s26, 4  ;;  %s284_s27 = int_to_ptr.vmem [resolvable:$true] %s283_s27 }
  0x13   : > { %s3338_s29 = smov [#allocation5]   ;;  %s3209_s18 = scalar_lea.hbm %s3874_s1, 256 }
  0x14   : > { %s3897_s25 = scalar_select %p3450_p10, 1, 0 }
  0x15   : > { %p3119_p11 = pneg %p3450_p10  ;;  %s296_s30 = sshll.u32 %s3338_s29, 4  ;;  %s3462_s30 = int_to_ptr.vmem [resolvable:$true] %s296_s30 }
  0x16   : > { %p3210_p13 = scmp.ne.s32.totalorder %s3874_s1, %s3209_s18  ;;  %p3216_p3 = scmp.lt.u32.totalorder %s3209_s18, %s3874_s1 }
  0x17   : > { %p3458_p12 = pnand %p3884_p9, %p3119_p11 }
  0x19   : > { %p3211_p0 = pneg %p3458_p12 }
  0x1b   : > { %p3212_p1 = pnand %p3211_p0, %p3210_p13 }
  0x1d   : > { %p3213_p2 = pneg %p3212_p1 }
  0x1f   : > { %p3218_p4 = pnand %p3216_p3, %p3213_p2 }
  0x21   : > { %3221 = shalt.err (!%p3218_p4)
}
  0x22   : > { %s3222_s29 = scalar_lea.vmem %s284_s27, 256  ;;  %p3230_p9 = scmp.lt.s32.totalorder %s284_s27, %s284_s27 }
  0x23   : > { %p3223_p7 = scmp.ne.s32.totalorder %s284_s27, %s3222_s29  ;;  %p3231_p6 = scmp.lt.s32.totalorder %s3222_s29, %s3222_s29 }
  0x25   : > { %p3225_p8 = pnand %p3223_p7, %p3211_p0  ;;  %p3232_p5 = por %p3231_p6, %p3230_p9 }
  0x27   : > { %p3226_p11 = pneg %p3225_p8 }
  0x29   : > { %p3233_p10 = pnand %p3232_p5, %p3226_p11 }
  0x2b   : > { %3236 = shalt.err (!%p3233_p10)
}
  0x2c   : > { %s3339_s11 = smov 128   ;;  %s3340_s12 = smov 8  }
  0x2d   : > { %3122 = dma.hbm_to_vmem [thread:$0]  (!%p3458_p12), %s3874_s1, 256, %s284_s27, [#allocation3], %s3339_s11, %s3339_s11, %s3340_s12  }
  0x2e   : > { %s3237_s26 = scalar_lea.hbm %s3875_s2, 256 }
  0x2f   : > { %p3238_p13 = scmp.ne.s32.totalorder %s3875_s2, %s3237_s26  ;;  %p3244_p9 = scmp.lt.u32.totalorder %s3237_s26, %s3875_s2 }
  0x31   : > { %p3240_p5 = pnand %p3238_p13, %p3211_p0 }
  0x33   : > { %p3241_p6 = pneg %p3240_p5 }
  0x35   : > { %p3246_p10 = pnand %p3244_p9, %p3241_p6 }
  0x37   : > { %3249 = shalt.err (!%p3246_p10)
}
  0x38   : > { %s3250_s27 = scalar_lea.vmem %s3462_s30, 256  ;;  %p3258_p4 = scmp.lt.s32.totalorder %s3462_s30, %s3462_s30 }
  0x39   : > { %p3251_p1 = scmp.ne.s32.totalorder %s3462_s30, %s3250_s27  ;;  %p3259_p7 = scmp.lt.s32.totalorder %s3250_s27, %s3250_s27 }
  0x3b   : > { %p3253_p2 = pnand %p3251_p1, %p3211_p0  ;;  %p3260_p8 = por %p3259_p7, %p3258_p4 }
  0x3d   : > { %p3254_p3 = pneg %p3253_p2 }
  0x3f   : > { %p3261_p11 = pnand %p3260_p8, %p3254_p3 }
  0x41   : > { %3264 = shalt.err (!%p3261_p11)
}
  0x42   : > { %3125 = dma.hbm_to_vmem [thread:$0]  (!%p3458_p12), %s3875_s2, 256, %s3462_s30, [#allocation6], %s3339_s11, %s3339_s11, %s3340_s12  }
  0x43   : > { %p3899_p13 = scmp.ne.s32.totalorder %s3897_s25, 0 }
  0x44   : > { %p3900_p5 = scmp.eq.s32.totalorder (!%p3899_p13), %s3422_s17, 0 }
  0x45   : > { %342 = sbr.rel (%p3899_p13) target bundleno = 2626 (0xa42), region = 60 }
  0x4c   : > { %3310 = dma.done.wait (%p3900_p5), [#allocation3], 256   ;;  %p3901_p0 = pmov %p3900_p5 }
  0x4e   : > { %3312 = vsyncadd (%p3901_p0), [#allocation3], 4294967040  ;;  %p3902_p6 = pmov %p3901_p0 }
  0x4f   : > { %p3903_p9 = pmov %p3901_p0 }
  0x50   : > { %3314 = dma.done.wait (%p3902_p6), [#allocation6], 256  }
  0x51   : > { %3316 = vsyncadd (%p3903_p9), [#allocation6], 4294967040  ;;  %s2487_s24 = sshll.u32 %s3422_s17, 3  ;;  %v3341_v0 = vmov 0   ;;  %vm394_vm0 = vcmask 130048   ;;  %v392_v1 = vld [vmem:[#allocation5] sm:$0xff]  ;;  %v484_v13 = vlaneseq }
  0x52   : > { %3175 = vset.pattern.permute.xlu0 %v3341_v0  ;;  %p385_p12 = scmp.lt.s32.totalorder %s2487_s24, 15  ;;  %3176 = vset.pattern.permute.xlu1 %v3341_v0  ;;  %v393_v2 = vld [vmem:[#allocation5 + $0x8] sm:$0xff]  ;;  %v390_v3 = vld [vmem:[#allocation2] sm:$0xff]  ;;  %v391_v8 = vld [vmem:[#allocation2 + $0x8] sm:$0xff]  ;;  %v3342_v16 = vmov 0.0   ;;  %v3343_v36 = vmov 0.0|0.0  }
  0x53   : > { %v2942_v4 = vpack.c.bf16 %v393_v2, %v392_v1  ;;  %2670 = vmatprep.mubr.msk.f32.mxu0 %vm394_vm0, %v390_v3  ;;  %v3536_v14 = vand.u32 127, %v484_v13  ;;  %v670_v33 = vld [vmem:[%s3876_s3] sm:$0xff]  ;;  %v671_v34 = vld [vmem:[%s3876_s3 + $0x8] sm:$0xff]  ;;  %v672_v35 = vld [vmem:[%s3876_s3 + $0x10] sm:$0xff]  ;;  %vm3344_vm8 = vmmov 0   ;;  %vm701_vm9 = vcmask 261120  }
  0x54   : > { %s3913_s24 = smov (!%p385_p12, %s2487_s24), 15  ;;  %v3569_v37 = vpack.c.bf16 %v671_v34, %v670_v33  ;;  %v673_v38 = vld [vmem:[%s3876_s3 + $0x18] sm:$0xff]  ;;  %v3587_v41 = vld [vmem:[%s3877_s4] ss:$0 sm:$0xff]  ;;  %v675_v46 = vld [vmem:[%s3878_s5 + $0x8] sm:$0xff]  ;;  %s381_s29 = sand.u32 1, %s3327_s14  }
  0x55   : > { %s2488_s25 = sshll.u32 %s3913_s24, 3  ;;  %2943 = vmatprep.subr.bf16.mxu0 %v2942_v4  ;;  %v3578_v39 = vpack.c.bf16 %v673_v38, %v672_v35  ;;  %v674_v45 = vld [vmem:[%s3878_s5] sm:$0xff]  ;;  %v676_v48 = vld [vmem:[%s3878_s5 + $0x10] sm:$0xff]  ;;  %v677_v49 = vld [vmem:[%s3878_s5 + $0x18] sm:$0xff]  ;;  %s2486_s27 = sshll.u32 %s381_s29, 3 }
  0x56   : > { %s3525_s11 = scalar_lea.vmem %s3873_s0, %s2488_s25  ;;  %2945 = vmatpush3.bf16.msra.mxu0 %v2942_v4  ;;  %v3596_v47 = vpack.c.bf16 %v675_v46, %v674_v45  ;;  %v3606_v51 = vpack.c.bf16 %v677_v49, %v676_v48  ;;  %v678_v53 = vld [vmem:[%s3879_s6] sm:$0xff]  ;;  %v679_v54 = vld [vmem:[%s3879_s6 + $0x8] sm:$0xff]  ;;  %v680_v57 = vld [vmem:[%s3879_s6 + $0x10] sm:$0xff]  ;;  %s2534_s24 = sshll.u32 %s3422_s17, 7 }
  0x57   : > { %v476_v5 = vld [vmem:[%s3525_s11] sm:$0xff]  ;;  %v478_v6 = vld [vmem:[%s3525_s11 + $0x10] sm:$0xff]  ;;  %v477_v7 = vld [vmem:[%s3525_s11 + $0x8] sm:$0xff]  ;;  %2950 = vmatprep.subr.bf16.mxu0 %v3343_v36  ;;  %v3628_v56 = vpack.c.bf16 %v679_v54, %v678_v53  ;;  %s383_s25 = scalar_lea.vmem [#allocation7], %s2486_s27  ;;  %s3831_s12 = scalar_lea.hbm %s3883_s10, %s2534_s24 }
  0x58   : > { %487 = vperm.xlu0 %3175, %v476_v5   ;;  %493 = vperm.xlu1 %3176, %v478_v6   ;;  %v479_v9 = vld [vmem:[%s3525_s11 + $0x18] sm:$0xff]  ;;  %v480_v10 = vld [vmem:[%s3525_s11 + $0x20] sm:$0xff]  ;;  %v481_v11 = vld [vmem:[%s3525_s11 + $0x28] sm:$0xff]  ;;  %s2397_s28 = sshll.u32 %s383_s25, 4  ;;  %s2384_s22 = scalar_lea.sflag [#allocation4], %s381_s29  ;;  %s3833_s28 = int_to_ptr.vmem [resolvable:$true] %s2397_s28 }
  0x59   : > { %2671 = vmatmul.mubr.msk.f32.vlgmr.msra.gmra.mrb[0].mxu0 %vm394_vm0, %v391_v8  ;;  %v482_v12 = vld [vmem:[%s3525_s11 + $0x30] sm:$0xff]  ;;  %v483_v40 = vld [vmem:[%s3525_s11 + $0x38] sm:$0xff]  ;;  %v3655_v4 = vld [vmem:[%s3880_s7] ss:$0 sm:$0xff]  ;;  %s3265_s18 = scalar_lea.vmem %s3833_s28, 128  ;;  %p3904_p1 = scmp.ne.s32.totalorder %s3894_s23, 0 }
  0x5a   : > { %2697 = vmatprep.mubr.msk.f32.mxu0 %vm3344_vm8, %v3342_v16  ;;  %2952 = vmatpush3.bf16.msra.mxu0 %v3569_v37  ;;  %v681_v58 = vld [vmem:[%s3879_s6 + $0x18] sm:$0xff]  ;;  %p3266_p10 = scmp.ne.s32.totalorder %s3833_s28, %s3265_s18  ;;  %s3345_s17 = smov [#allocation7]  }
  0x5b   : > { %2953 = vmatprep.subr.bf16.mxu0 %v3343_v36  ;;  %v3641_v59 = vpack.c.bf16 %v681_v58, %v680_v57  ;;  %s3269_s20 = sshll.u32 %s3345_s17, 4  ;;  %s3270_s20 = int_to_ptr.vmem [resolvable:$false] %s3269_s20 }
  0x5c   : > { %490 = vperm.xlu0 %3175, %v477_v7   ;;  %496 = vperm.xlu1 %3176, %v479_v9   ;;  %p3267_p2 = pnand %p3266_p10, %p3904_p1  ;;  %s3271_s21 = scalar_lea.vmem %s3270_s20, 256 }
  0x5d   : > { %p3272_p4 = scmp.lt.s32.totalorder %s3833_s28, %s3270_s20  ;;  %p3273_p7 = scmp.lt.s32.totalorder %s3271_s21, %s3265_s18 }
  0x5e   : > { %2955 = vmatpush3.bf16.msra.mxu0 %v3578_v39  ;;  %p3268_p3 = pneg %p3267_p2 }
  0x5f   : > { %2956 = vmatprep.subr.bf16.mxu0 %v3343_v36  ;;  %p3274_p8 = por %p3273_p7, %p3272_p4 }
  0x60   : > { %499 = vperm.xlu0 %3175, %v480_v10   ;;  %502 = vperm.xlu1 %3176, %v481_v11  }
  0x61   : > { %p3275_p11 = pnand %p3274_p8, %p3268_p3 }
  0x64   : > { %505 = vperm.xlu0 %3175, %v482_v12   ;;  %508 = vperm.xlu1 %3176, %v483_v40  }
  0xd7   : > { %v488_v15 = vpop.permute.xlu0 %487  ;;  %v494_v18 = vpop.permute.xlu1 %493 }
  0xd8   : > { %vm510_vm1 = vcmp.eq.s32.totalorder %v3536_v14, %v488_v15  ;;  %vm512_vm2 = vcmp.eq.s32.totalorder %v3536_v14, %v494_v18 }
  0xd9   : > { %v2491_v17 = vsel %vm510_vm1, 1.0, %v3342_v16  ;;  %v2493_v25 = vsel %vm512_vm2, 1.0, %v3342_v16 }
  0xda   : > { %2677 = vmatprep.mubr.msk.f32.mxu1 %vm394_vm0, %v2491_v17 }
  0xdb   : > { %v491_v19 = vpop.permute.xlu0 %490  ;;  %v497_v22 = vpop.permute.xlu1 %496 }
  0xdc   : > { %vm511_vm3 = vcmp.eq.s32.totalorder %v3536_v14, %v491_v19  ;;  %vm513_vm4 = vcmp.eq.s32.totalorder %v3536_v14, %v497_v22 }
  0xdd   : > { %v2492_v26 = vsel %vm511_vm3, 1.0, %v3342_v16  ;;  %v2494_v28 = vsel %vm513_vm4, 1.0, %v3342_v16 }
  0xdf   : > { %v500_v24 = vpop.permute.xlu0 %499  ;;  %v503_v27 = vpop.permute.xlu1 %502 }
  0xe0   : > { %vm514_vm5 = vcmp.eq.s32.totalorder %v3536_v14, %v500_v24  ;;  %vm515_vm6 = vcmp.eq.s32.totalorder %v3536_v14, %v503_v27 }
  0xe1   : > { %v2495_v30 = vsel %vm514_vm5, 1.0, %v3342_v16  ;;  %v2496_v31 = vsel %vm515_vm6, 1.0, %v3342_v16 }
  0xe3   : > { %v506_v29 = vpop.permute.xlu0 %505  ;;  %v509_v52 = vpop.permute.xlu1 %508 }
  0xe4   : > { %vm516_vm7 = vcmp.eq.s32.totalorder %v3536_v14, %v506_v29  ;;  %vm517_vm10 = vcmp.eq.s32.totalorder %v3536_v14, %v509_v52 }
  0xe5   : > { %v2497_v32 = vsel %vm516_vm7, 1.0, %v3342_v16  ;;  %v2498_v55 = vsel %vm517_vm10, 1.0, %v3342_v16 }
 0x12c   : > { %v2672_v20 = vpop.f32.mrb[0].mxu0 }
 0x12d   : > { %v467_v21 = vpop.f32.mrb[1].mxu0 }
 0x12e   : > { %v2946_v23 = vpack.c.bf16 %v2672_v20, %v467_v21 }
 0x130   : > { %2947 = vmatprep.subr.bf16.mxu1 %v2946_v23 }
 0x131   : > { %2949 = vmatpush3.bf16.msra.mxu1 %v2946_v23 }
 0x132   : > { %2962 = vmatprep.subr.bf16.mxu1 %v3343_v36 }
 0x134   : > { %2678 = vmatmul.mubr.msk.f32.vlgmr.msra.gmra.mrb[0].mxu1 %vm394_vm0, %v2492_v26 }
 0x135   : > { %2680 = vmatprep.mubr.msk.f32.mxu1 %vm394_vm0, %v2493_v25  ;;  %2964 = vmatpush3.bf16.msra.mxu1 %v3628_v56 }
 0x136   : > { %2965 = vmatprep.subr.bf16.mxu1 %v3343_v36 }
 0x138   : > { %2681 = vmatmul.mubr.msk.f32.gmra.mrb[2].mxu1 %vm394_vm0, %v2494_v28 }
 0x139   : > { %2683 = vmatprep.mubr.msk.f32.mxu1 %vm394_vm0, %v2495_v30  ;;  %2967 = vmatpush3.bf16.msra.mxu1 %v3641_v59 }
 0x13a   : > { %2974 = vmatprep.subr.bf16.mxu1 %v3343_v36 }
 0x13c   : > { %2684 = vmatmul.mubr.msk.f32.gmra.mrb[4].mxu1 %vm394_vm0, %v2496_v31 }
 0x13d   : > { %2686 = vmatprep.mubr.msk.f32.mxu1 %vm394_vm0, %v2497_v32 }
 0x140   : > { %2687 = vmatmul.mubr.msk.f32.gmra.mrb[6].mxu1 %vm394_vm0, %v2498_v55 }
 0x141   : > { %2719 = vmatprep.mubr.msk.f32.mxu1 %vm3344_vm8, %v3342_v16 }
 0x207   : > { %v2679_v42 = vpop.f32.mrb[0].mxu1 }
 0x208   : > { %v631_v43 = vpop.f32.mrb[1].mxu1  ;;  %v637_v0 = vadd.f32 %v2679_v42, %v3587_v41 }
 0x209   : > { %v632_v44 = vadd.f32 %v3587_v41, %v631_v43 }
 0x20b   : > { %3177 = vtanh.f32 %v632_v44  ;;  %v3645_v60 = vpop.f32.mrb[2].mxu1 }
 0x20c   : > { %v641_v61 = vpop.f32.mrb[3].mxu1  ;;  %v647_v22 = vadd.f32 %v3645_v60, %v3587_v41 }
 0x20d   : > { %v642_v12 = vadd.f32 %v3587_v41, %v641_v61 }
 0x20f   : > { %v3647_v62 = vpop.f32.mrb[4].mxu1 }
 0x210   : > { %v3649_v63 = vpop.f32.mrb[5].mxu1  ;;  %v657_v44 = vadd.f32 %v3647_v62, %v3587_v41 }
 0x211   : > { %v652_v31 = vadd.f32 %v3587_v41, %v3649_v63 }
 0x213   : > { %v3679_v10 = vpop.f32.mrb[6].mxu1 }
 0x214   : > { %v3681_v11 = vpop.f32.mrb[7].mxu1 }
 0x215   : > { %v3178_v50 = vpop.eup %3177  ;;  %v662_v55 = vadd.f32 %v3587_v41, %v3681_v11 }
 0x216   : > { %2698 = vmatmul.mubr.msk.f32.vlgmr.msra.gmra.mrb[2].mxu0 %vm701_vm9, %v3178_v50 }
 0x217   : > { %2958 = vmatpush3.bf16.msra.mxu0 %v3596_v47  ;;  %2708 = vmatprep.mubr.msk.f32.mxu0 %vm3344_vm8, %v3342_v16 }
 0x218   : > { %2959 = vmatprep.subr.bf16.mxu0 %v3343_v36 }
 0x21b   : > { %2961 = vmatpush3.bf16.msra.mxu0 %v3606_v51 }
 0x21c   : > { %2968 = vmatprep.subr.bf16.mxu0 %v3343_v36 }
 0x21e   : > { %2709 = vmatmul.mubr.msk.f32.vlgmr.msra.gmra.mrb[4].mxu0 %vm701_vm9, %v3178_v50 }
 0x21f   : > { %2970 = vmatpush3.bf16.msra.mxu0 %v3569_v37  ;;  %2730 = vmatprep.mubr.msk.f32.mxu0 %vm3344_vm8, %v3342_v16 }
 0x220   : > { %2971 = vmatprep.subr.bf16.mxu0 %v3343_v36 }
 0x223   : > { %2973 = vmatpush3.bf16.msra.mxu0 %v3578_v39 }
 0x224   : > { %2980 = vmatprep.subr.bf16.mxu0 %v3343_v36 }
 0x2e9   : > { %v771_v1 = vpop.f32.mrb[2].mxu0 }
 0x2ea   : > { %v919_v2 = vadd.f32 %v771_v1, %v637_v0  ;;  %v2699_v3 = vpop.f32.mrb[3].mxu0 }
 0x2ec   : > { %3179 = vtanh.f32 %v919_v2 }
 0x2f1   : > { %v841_v5 = vpop.f32.mrb[4].mxu0 }
 0x2f2   : > { %v842_v6 = vadd.f32 %v3655_v4, %v841_v5  ;;  %v2710_v7 = vpop.f32.mrb[5].mxu0 }
 0x2f3   : > { %v689_v7 = vld [vmem:[%s3881_s8] sm:$0xff] }
 0x2f4   : > { %3181 = vtanh.f32 %v842_v6 }
 0x2f6   : > { %v3180_v8 = vpop.eup %3179 }
 0x2f7   : > { %2731 = vmatmul.mubr.msk.f32.vlgmr.msra.gmra.mrb[6].mxu0 %vm701_vm9, %v3180_v8 }
 0x2f8   : > { %2982 = vmatpush3.bf16.msra.mxu0 %v3628_v56  ;;  %2752 = vmatprep.mubr.msk.f32.mxu0 %vm3344_vm8, %v3342_v16 }
 0x2f9   : > { %2983 = vmatprep.subr.bf16.mxu0 %v3343_v36 }
 0x2fc   : > { %2985 = vmatpush3.bf16.msra.mxu0 %v3641_v59 }
 0x2fd   : > { %2992 = vmatprep.subr.bf16.mxu0 %v3343_v36 }
 0x2fe   : > { %v3182_v9 = vpop.eup %3181 }
 0x2ff   : > { %2720 = vmatmul.mubr.msk.f32.vlgmr.msra.gmra.mrb[8].mxu1 %vm701_vm9, %v3182_v9 }
 0x300   : > { %2976 = vmatpush3.bf16.msra.mxu1 %v3596_v47  ;;  %2741 = vmatprep.mubr.msk.f32.mxu1 %vm3344_vm8, %v3342_v16 }
 0x301   : > { %2977 = vmatprep.subr.bf16.mxu1 %v3343_v36 }
 0x304   : > { %2979 = vmatpush3.bf16.msra.mxu1 %v3606_v51 }
 0x305   : > { %2986 = vmatprep.subr.bf16.mxu1 %v3343_v36 }
 0x307   : > { %2742 = vmatmul.mubr.msk.f32.vlgmr.msra.gmra.mrb[8].mxu1 %vm701_vm9, %v3180_v8  ;;  %v690_v8 = vld [vmem:[%s3881_s8 + $0x8] sm:$0xff] }
 0x308   : > { %2988 = vmatpush3.bf16.msra.mxu1 %v3569_v37  ;;  %2763 = vmatprep.mubr.msk.f32.mxu1 %vm3344_vm8, %v3342_v16 }
 0x309   : > { %2989 = vmatprep.subr.bf16.mxu1 %v3343_v36 }
 0x30c   : > { %2991 = vmatpush3.bf16.msra.mxu1 %v3578_v39 }
 0x30d   : > { %2998 = vmatprep.subr.bf16.mxu1 %v3343_v36 }
 0x3ca   : > { %v990_v13 = vpop.f32.mrb[6].mxu0 }
 0x3cb   : > { %v1138_v14 = vadd.f32 %v990_v13, %v642_v12  ;;  %v2732_v15 = vpop.f32.mrb[7].mxu0 }
 0x3cd   : > { %3183 = vtanh.f32 %v1138_v14  ;;  %v2509_v14 = vld [vmem:[%s3882_s9] ss:$0 sm:$0xff] }
 0x3d7   : > { %v3184_v17 = vpop.eup %3183 }
 0x3d8   : > { %2764 = vmatmul.mubr.msk.f32.vlgmr.msra.gmra.mrb[10].mxu1 %vm701_vm9, %v3184_v17 }
 0x3d9   : > { %3000 = vmatpush3.bf16.msra.mxu1 %v3628_v56  ;;  %2785 = vmatprep.mubr.msk.f32.mxu1 %vm3344_vm8, %v3342_v16 }
 0x3da   : > { %v1060_v18 = vpop.f32.mrb[8].mxu1  ;;  %3001 = vmatprep.subr.bf16.mxu1 %v3343_v36 }
 0x3db   : > { %v3088_v19 = vadd.f32 %v3655_v4, %v1060_v18  ;;  %v2743_v20 = vpop.f32.mrb[9].mxu1 }
 0x3dd   : > { %3185 = vtanh.f32 %v3088_v19  ;;  %3003 = vmatpush3.bf16.msra.mxu1 %v3641_v59 }
 0x3de   : > { %3010 = vmatprep.subr.bf16.mxu1 %v3343_v36 }
 0x3e7   : > { %v3186_v21 = vpop.eup %3185 }
 0x3e8   : > { %2753 = vmatmul.mubr.msk.f32.vlgmr.msra.gmra.mrb[8].mxu0 %vm701_vm9, %v3186_v21 }
 0x3e9   : > { %2994 = vmatpush3.bf16.msra.mxu0 %v3596_v47  ;;  %2774 = vmatprep.mubr.msk.f32.mxu0 %vm3344_vm8, %v3342_v16 }
 0x3ea   : > { %2995 = vmatprep.subr.bf16.mxu0 %v3343_v36 }
 0x3ed   : > { %2997 = vmatpush3.bf16.msra.mxu0 %v3606_v51 }
 0x3ee   : > { %3004 = vmatprep.subr.bf16.mxu0 %v3343_v36 }
 0x3f0   : > { %2775 = vmatmul.mubr.msk.f32.vlgmr.msra.gmra.mrb[8].mxu0 %vm701_vm9, %v3184_v17 }
 0x3f1   : > { %3006 = vmatpush3.bf16.msra.mxu0 %v3569_v37  ;;  %2796 = vmatprep.mubr.msk.f32.mxu0 %vm3344_vm8, %v3342_v16 }
 0x3f2   : > { %3007 = vmatprep.subr.bf16.mxu0 %v3343_v36 }
 0x3f5   : > { %3009 = vmatpush3.bf16.msra.mxu0 %v3578_v39 }
 0x3f6   : > { %3016 = vmatprep.subr.bf16.mxu0 %v3343_v36 }
 0x4ab   : > { %v1209_v23 = vpop.f32.mrb[10].mxu1 }
 0x4ac   : > { %v1357_v24 = vadd.f32 %v1209_v23, %v647_v22  ;;  %v2765_v25 = vpop.f32.mrb[11].mxu1 }
 0x4ae   : > { %3187 = vtanh.f32 %v1357_v24 }
 0x4b8   : > { %v3188_v26 = vpop.eup %3187 }
 0x4b9   : > { %2797 = vmatmul.mubr.msk.f32.vlgmr.msra.gmra.mrb[10].mxu0 %vm701_vm9, %v3188_v26 }
 0x4ba   : > { %3018 = vmatpush3.bf16.msra.mxu0 %v3628_v56  ;;  %2818 = vmatprep.mubr.msk.f32.mxu0 %vm3344_vm8, %v3342_v16 }
 0x4bb   : > { %3019 = vmatprep.subr.bf16.mxu0 %v3343_v36 }
 0x4be   : > { %3021 = vmatpush3.bf16.msra.mxu0 %v3641_v59 }
 0x4bf   : > { %3028 = vmatprep.subr.bf16.mxu0 %v3343_v36 }
 0x4c3   : > { %v1279_v27 = vpop.f32.mrb[8].mxu0 }
 0x4c4   : > { %v3089_v28 = vadd.f32 %v3655_v4, %v1279_v27  ;;  %v2776_v29 = vpop.f32.mrb[9].mxu0 }
 0x4c6   : > { %3189 = vtanh.f32 %v3089_v28 }
 0x4d0   : > { %v3190_v30 = vpop.eup %3189 }
 0x4d1   : > { %2786 = vmatmul.mubr.msk.f32.vlgmr.msra.gmra.mrb[12].mxu1 %vm701_vm9, %v3190_v30 }
 0x4d2   : > { %3012 = vmatpush3.bf16.msra.mxu1 %v3596_v47  ;;  %2807 = vmatprep.mubr.msk.f32.mxu1 %vm3344_vm8, %v3342_v16 }
 0x4d3   : > { %3013 = vmatprep.subr.bf16.mxu1 %v3343_v36 }
 0x4d6   : > { %3015 = vmatpush3.bf16.msra.mxu1 %v3606_v51 }
 0x4d7   : > { %3022 = vmatprep.subr.bf16.mxu1 %v3343_v36 }
 0x4d9   : > { %2808 = vmatmul.mubr.msk.f32.vlgmr.msra.gmra.mrb[12].mxu1 %vm701_vm9, %v3188_v26 }
 0x4da   : > { %3024 = vmatpush3.bf16.msra.mxu1 %v3569_v37  ;;  %2829 = vmatprep.mubr.msk.f32.mxu1 %vm3344_vm8, %v3342_v16 }
 0x4db   : > { %3025 = vmatprep.subr.bf16.mxu1 %v3343_v36 }
 0x4de   : > { %3027 = vmatpush3.bf16.msra.mxu1 %v3578_v39 }
 0x4df   : > { %3034 = vmatprep.subr.bf16.mxu1 %v3343_v36 }
 0x58c   : > { %v1428_v32 = vpop.f32.mrb[10].mxu0 }
 0x58d   : > { %v1576_v33 = vadd.f32 %v1428_v32, %v652_v31  ;;  %v2798_v34 = vpop.f32.mrb[11].mxu0 }
 0x58f   : > { %3191 = vtanh.f32 %v1576_v33 }
 0x599   : > { %v3192_v35 = vpop.eup %3191 }
 0x59a   : > { %2830 = vmatmul.mubr.msk.f32.vlgmr.msra.gmra.mrb[14].mxu1 %vm701_vm9, %v3192_v35 }
 0x59b   : > { %3036 = vmatpush3.bf16.msra.mxu1 %v3628_v56  ;;  %2851 = vmatprep.mubr.msk.f32.mxu1 %vm3344_vm8, %v3342_v16 }
 0x59c   : > { %3037 = vmatprep.subr.bf16.mxu1 %v3343_v36 }
 0x59f   : > { %3039 = vmatpush3.bf16.msra.mxu1 %v3641_v59 }
 0x5a0   : > { %3046 = vmatprep.subr.bf16.mxu1 %v3343_v36 }
 0x5ac   : > { %v1498_v38 = vpop.f32.mrb[12].mxu1 }
 0x5ad   : > { %v3090_v40 = vadd.f32 %v3655_v4, %v1498_v38  ;;  %v2809_v42 = vpop.f32.mrb[13].mxu1 }
 0x5af   : > { %3193 = vtanh.f32 %v3090_v40 }
 0x5b9   : > { %v3194_v43 = vpop.eup %3193 }
 0x5ba   : > { %2819 = vmatmul.mubr.msk.f32.vlgmr.msra.gmra.mrb[12].mxu0 %vm701_vm9, %v3194_v43 }
 0x5bb   : > { %3030 = vmatpush3.bf16.msra.mxu0 %v3596_v47  ;;  %2840 = vmatprep.mubr.msk.f32.mxu0 %vm3344_vm8, %v3342_v16 }
 0x5bc   : > { %3031 = vmatprep.subr.bf16.mxu0 %v3343_v36 }
 0x5bf   : > { %3033 = vmatpush3.bf16.msra.mxu0 %v3606_v51 }
 0x5c0   : > { %3040 = vmatprep.subr.bf16.mxu0 %v3343_v36 }
 0x5c2   : > { %2841 = vmatmul.mubr.msk.f32.vlgmr.msra.gmra.mrb[12].mxu0 %vm701_vm9, %v3192_v35 }
 0x5c3   : > { %3042 = vmatpush3.bf16.msra.mxu0 %v3569_v37  ;;  %2862 = vmatprep.mubr.msk.f32.mxu0 %vm3344_vm8, %v3342_v16 }
 0x5c4   : > { %3043 = vmatprep.subr.bf16.mxu0 %v3343_v36 }
 0x5c7   : > { %3045 = vmatpush3.bf16.msra.mxu0 %v3578_v39 }
 0x5c8   : > { %3052 = vmatprep.subr.bf16.mxu0 %v3343_v36 }
 0x66d   : > { %v1647_v45 = vpop.f32.mrb[14].mxu1 }
 0x66e   : > { %v1795_v46 = vadd.f32 %v1647_v45, %v657_v44  ;;  %v2831_v48 = vpop.f32.mrb[15].mxu1 }
 0x670   : > { %3195 = vtanh.f32 %v1795_v46 }
 0x67a   : > { %v3196_v49 = vpop.eup %3195 }
 0x67b   : > { %2863 = vmatmul.mubr.msk.f32.vlgmr.msra.gmra.mrb[14].mxu0 %vm701_vm9, %v3196_v49 }
 0x67c   : > { %3054 = vmatpush3.bf16.msra.mxu0 %v3628_v56  ;;  %2884 = vmatprep.mubr.msk.f32.mxu0 %vm3344_vm8, %v3342_v16 }
 0x67d   : > { %3055 = vmatprep.subr.bf16.mxu0 %v3343_v36 }
 0x680   : > { %3057 = vmatpush3.bf16.msra.mxu0 %v3641_v59 }
 0x681   : > { %3064 = vmatprep.subr.bf16.mxu0 %v3343_v36 }
 0x695   : > { %v1717_v50 = vpop.f32.mrb[12].mxu0 }
 0x696   : > { %v3091_v52 = vadd.f32 %v3655_v4, %v1717_v50  ;;  %v2842_v53 = vpop.f32.mrb[13].mxu0 }
 0x698   : > { %3197 = vtanh.f32 %v3091_v52 }
 0x6a2   : > { %v3198_v54 = vpop.eup %3197 }
 0x6a3   : > { %2852 = vmatmul.mubr.msk.f32.vlgmr.msra.gmra.mrb[16].mxu1 %vm701_vm9, %v3198_v54 }
 0x6a4   : > { %3048 = vmatpush3.bf16.msra.mxu1 %v3596_v47  ;;  %2873 = vmatprep.mubr.msk.f32.mxu1 %vm3344_vm8, %v3342_v16 }
 0x6a5   : > { %3049 = vmatprep.subr.bf16.mxu1 %v3343_v36 }
 0x6a8   : > { %3051 = vmatpush3.bf16.msra.mxu1 %v3606_v51 }
 0x6a9   : > { %3058 = vmatprep.subr.bf16.mxu1 %v3343_v36 }
 0x6ab   : > { %2874 = vmatmul.mubr.msk.f32.vlgmr.msra.gmra.mrb[16].mxu1 %vm701_vm9, %v3196_v49 }
 0x6ac   : > { %3060 = vmatpush3.bf16.msra.mxu1 %v3569_v37  ;;  %2895 = vmatprep.mubr.msk.f32.mxu1 %vm3344_vm8, %v3342_v16 }
 0x6ad   : > { %3061 = vmatprep.subr.bf16.mxu1 %v3343_v36 }
 0x6b0   : > { %3063 = vmatpush3.bf16.msra.mxu1 %v3578_v39 }
 0x6b1   : > { %3070 = vmatprep.subr.bf16.mxu1 %v3343_v36 }
 0x74e   : > { %v1866_v57 = vpop.f32.mrb[14].mxu0 }
 0x74f   : > { %v2014_v58 = vadd.f32 %v1866_v57, %v662_v55  ;;  %v2864_v60 = vpop.f32.mrb[15].mxu0 }
 0x751   : > { %3199 = vtanh.f32 %v2014_v58 }
 0x75b   : > { %v3200_v61 = vpop.eup %3199 }
 0x75c   : > { %2896 = vmatmul.mubr.msk.f32.vlgmr.msra.gmra.mrb[18].mxu1 %vm701_vm9, %v3200_v61 }
 0x75d   : > { %3072 = vmatpush3.bf16.msra.mxu1 %v3628_v56  ;;  %2917 = vmatprep.mubr.msk.f32.mxu1 %vm3344_vm8, %v3342_v16  ;;  %v667_v56 = vadd.f32 %v3679_v10, %v3587_v41 }
 0x75e   : > { %3073 = vmatprep.subr.bf16.mxu1 %v3343_v36 }
 0x761   : > { %3075 = vmatpush3.bf16.msra.mxu1 %v3641_v59 }
 0x762   : > { %3076 = vmatprep.subr.bf16.mxu1 %v3343_v36 }
 0x77e   : > { %v1936_v37 = vpop.f32.mrb[16].mxu1 }
 0x77f   : > { %v3092_v39 = vadd.f32 %v3655_v4, %v1936_v37  ;;  %v2875_v62 = vpop.f32.mrb[17].mxu1 }
 0x781   : > { %3201 = vtanh.f32 %v3092_v39 }
 0x78b   : > { %v3202_v63 = vpop.eup %3201 }
 0x78c   : > { %2885 = vmatmul.mubr.msk.f32.vlgmr.msra.gmra.mrb[16].mxu0 %vm701_vm9, %v3202_v63 }
 0x78d   : > { %3066 = vmatpush3.bf16.msra.mxu0 %v3596_v47  ;;  %2906 = vmatprep.mubr.msk.f32.mxu0 %vm3344_vm8, %v3342_v16 }
 0x78e   : > { %3067 = vmatprep.subr.bf16.mxu0 %v3343_v36 }
 0x791   : > { %3069 = vmatpush3.bf16.msra.mxu0 %v3606_v51 }
 0x792   : > { %3082 = vmatprep.subr.bf16.mxu0 %v3343_v36 }
 0x794   : > { %2907 = vmatmul.mubr.msk.f32.vlgmr.msra.gmra.mrb[16].mxu0 %vm701_vm9, %v3200_v61 }
 0x795   : > { %2939 = vmatprep.mubr.msk.f32.mxu0 %vm3344_vm8, %v3342_v16 }
 0x82f   : > { %v2085_v59 = vpop.f32.mrb[18].mxu1 }
 0x830   : > { %v2233_v0 = vadd.f32 %v2085_v59, %v667_v56  ;;  %v2897_v1 = vpop.f32.mrb[19].mxu1 }
 0x867   : > { %v2155_v2 = vpop.f32.mrb[16].mxu0 }
 0x868   : > { %v3093_v3 = vadd.f32 %v3655_v4, %v2155_v2  ;;  %v2908_v5 = vpop.f32.mrb[17].mxu0 }
 0x86a   : > { %3203 = vtanh.f32 %v3093_v3 }
 0x86b   : > { %3205 = vtanh.f32 %v2233_v0 }
 0x874   : > { %v3204_v6 = vpop.eup %3203 }
 0x875   : > { %2918 = vmatmul.mubr.msk.f32.vlgmr.msra.gmra.mrb[20].mxu1 %vm701_vm9, %v3204_v6  ;;  %v3206_v41 = vpop.eup %3205 }
 0x876   : > { %3078 = vmatpush3.bf16.msra.mxu1 %v3596_v47  ;;  %2928 = vmatprep.mubr.msk.f32.mxu1 %vm3344_vm8, %v3342_v16  ;;  %v691_v16 = vld [vmem:[%s3881_s8 + $0x10] sm:$0xff]  ;;  %v3083_v47 = vpack.c.bf16 %v690_v8, %v689_v7 }
 0x877   : > { %3079 = vmatprep.subr.bf16.mxu1 %v3343_v36 }
 0x878   : > { %3084 = vmatpush3.bf16.msra.mxu0 %v3083_v47 }
 0x879   : > { %3085 = vmatprep.subr.bf16.mxu0 %v3343_v36 }
 0x87a   : > { %3081 = vmatpush3.bf16.msra.mxu1 %v3606_v51  ;;  %v692_v51 = vld [vmem:[%s3881_s8 + $0x18] sm:$0xff] }
 0x87b   : > { %v3086_v9 = vpack.c.bf16 %v692_v51, %v691_v16 }
 0x87d   : > { %2929 = vmatmul.mubr.msk.f32.vlgmr.msra.gmra.mrb[20].mxu1 %vm701_vm9, %v3206_v41  ;;  %3087 = vmatpush3.bf16.msra.mxu0 %v3086_v9 }
 0x950   : > { %v2304_v10 = vpop.f32.mrb[20].mxu1 }
 0x951   : > { %v3094_v11 = vadd.f32 %v3655_v4, %v2304_v10  ;;  %v2930_v12 = vpop.f32.mrb[21].mxu1 }
 0x953   : > { %3207 = vtanh.f32 %v3094_v11 }
 0x95d   : > { %v3208_v13 = vpop.eup %3207 }
 0x95e   : > { %2940 = vmatmul.mubr.msk.f32.vlgmr.msra.gmra.mrb[18].mxu0 %vm701_vm9, %v3208_v13 }
 0xa31   : > { %v2378_v36 = vpop.f32.mrb[18].mxu0 }
 0xa32   : > { %v2379_v15 = vadd.f32 %v2509_v14, %v2378_v36  ;;  %v2941_v17 = vpop.f32.mrb[19].mxu0 }
 0xa34   : > { %2382 = vst [vmem:[%s383_s25] sm:$0xff] %v2379_v15 }
 0xa35   : > { %3278 = shalt.err (!%p3275_p11)
}
 0xa36   : > { %s3279_s26 = scalar_lea.hbm %s3831_s12, 128  ;;  %s3283_s15 = scalar_lea.hbm %s3883_s10, 256 }
 0xa37   : > { %p3280_p13 = scmp.ne.s32.totalorder %s3831_s12, %s3279_s26  ;;  %p3284_p6 = scmp.lt.u32.totalorder %s3831_s12, %s3883_s10 }
 0xa38   : > { %p3285_p9 = scmp.lt.u32.totalorder %s3283_s15, %s3279_s26  ;;  %p3287_p10 = scmp.lt.u32.totalorder %s3279_s26, %s3831_s12 }
 0xa39   : > { %p3281_p5 = pnand %p3280_p13, %p3904_p1 }
 0xa3a   : > { %p3286_p12 = por %p3285_p9, %p3284_p6 }
 0xa3b   : > { %p3282_p0 = pneg %p3281_p5 }
 0xa3c   : > { %p3288_p2 = por %p3287_p10, %p3286_p12 }
 0xa3e   : > { %p3289_p3 = pnand %p3288_p2, %p3282_p0 }
 0xa40   : > { %3292 = shalt.err (!%p3289_p3)
}
 0xa41   : > { %3117 = dma.vmem_to_hbm [thread:$0]  (%p3904_p1), %s3833_s28, 128, %s3831_s12, %s2384_s22  }
 0xa42 PF: > { %s3905_s25 = sld [smem:[#allocation14_spill]]  ;;  %p3134_p4 = scmp.ge.s32.totalorder %s3335_s16, 2 }
 0xa43   : > { %s2409_s30 = sand.u32 1, %s3323_s13  }
 0xa44   : > { %s2410_s11 = scalar_lea.sflag [#allocation4], %s2409_s30 }
 0xa48   : > { %p3906_p7 = scmp.ne.s32.totalorder %s3905_s25, 0 }
 0xa4a   : > { %p3127_p8 = pnand %p3134_p4, %p3906_p7 }
 0xa4c   : > { %3318 = dma.done.wait (!%p3127_p8), %s2410_s11, 128  }
 0xa4d   : > { %3320 = vsyncadd (!%p3127_p8), %s2410_s11, 4294967168  ;;  %s3907_s16 = sld [smem:[#allocation12_spill]]  ;;  %s3908_s18 = sld [smem:[#allocation11_spill]] }
 0xa4e   : > { %s3909_s15 = sld [smem:[#allocation13_spill]]  ;;  %s3910_s13 = smov %s3327_s14 }
 0xa53   : > { %p22_p11 = scmp.ge.s32.totalorder %s3907_s16, 4   ;;  %s3911_s14 = smov %s3908_s18 }
 0xa55   :  { %24 = sbr.rel (!%p22_p11) target bundleno = 5 (0x5), region = 104 }
 0xa5c   :  { %2415 = vsyncpa [#allocation3], 1 }
 0xa5d   :  { %2417 = vsyncpa [#allocation3 + $0x1], 1 }
 0xa5e   :  { %2418 = vsyncpa [#allocation6], 1 }
 0xa5f   :  { %2419 = vsyncpa [#allocation4], 1 }
 0xa60   :  { %2421 = vsyncpa [#allocation4 + $0x1], 1 }

</bundles_post_ra>
